<compile_context>
chip_gen: v7x
topology: tpu7x:2x2x1
jax: 0.10.0
libtpu: 0.0.40
codegen_flags: <defaults>
</compile_context>

<pallas_src>
import functools
import math

import jax
import jax.numpy as jnp
from jax import lax
from jax.experimental import pallas as pl
from jax.experimental.pallas import tpu as pltpu

_LANE = 512            # lane-dense block width (multiple of 128)
_MAX_BLOCK_ROWS = 256  # 256 x 512 f32 = 512 KiB per block buffer


def _mix(h):
    """lowbias32-style uint32 finalizer (good avalanche, cheap VPU ops)."""
    h = h ^ (h >> jnp.uint32(16))
    h = h * jnp.uint32(0x7FEB352D)
    h = h ^ (h >> jnp.uint32(15))
    h = h * jnp.uint32(0x846CA68B)
    h = h ^ (h >> jnp.uint32(16))
    return h


def _bits_to_unit_float(bits_u32):
    """Map uint32 bits -> float32 uniform in [0, 1) via the mantissa trick."""
    mant = (bits_u32 >> jnp.uint32(9)) | jnp.uint32(0x3F800000)  # in [1, 2)
    return lax.bitcast_convert_type(mant, jnp.float32) - jnp.float32(1.0)


def _gaussian_noise_kernel(seed_ref, x_ref, o_ref, *, sigma):
    bm, lane = x_ref.shape
    half = bm // 2

    # Per-tile key: fold grid position into the seed so every tile (and every
    # TensorCore on v7x) draws an independent noise stream.
    tile = pl.program_id(0).astype(jnp.uint32)
    key = _mix(seed_ref[0].astype(jnp.uint32) ^ (tile * jnp.uint32(0x9E3779B9)))

    # Unique per-element counters over the top half of the block; each counter
    # yields two random streams and two Gaussian outputs (top + bottom half).
    rows = lax.broadcasted_iota(jnp.int32, (half, lane), 0).astype(jnp.uint32)
    cols = lax.broadcasted_iota(jnp.int32, (half, lane), 1).astype(jnp.uint32)
    c2 = (rows * jnp.uint32(lane) + cols) * jnp.uint32(2)

    phi = jnp.uint32(0x9E3779B9)
    b1 = _mix(c2 * phi + key)
    b2 = _mix((c2 + jnp.uint32(1)) * phi + key)

    u1 = jnp.float32(1.0) - _bits_to_unit_float(b1)   # (0, 1] -> safe for log
    u2 = _bits_to_unit_float(b2)                      # [0, 1)

    # Box-Muller, using BOTH outputs to halve EUP (transcendental) work.
    r = jnp.sqrt(jnp.float32(-2.0) * jnp.log(u1))
    theta = jnp.float32(2.0 * math.pi) * u2
    z1 = r * jnp.cos(theta)
    z2 = r * jnp.sin(theta)

    s = jnp.float32(sigma)
    x_top = x_ref[0:half, :]
    x_bot = x_ref[half:bm, :]
    o_ref[0:half, :] = x_top + (s * z1).astype(x_top.dtype)
    o_ref[half:bm, :] = x_bot + (s * z2).astype(x_bot.dtype)


def gaussian_noise(x, sigma, seed=0, training=True):
    """Pallas equivalent of GaussianNoise.forward. x: (N, C, H, W) float array."""
    if not training:
        return x

    orig_shape = x.shape
    total = x.size

    # Lane-dense padded slab: (rows, _LANE) with rows a multiple of the block
    # row count (block rows are a multiple of 16 so each half is sublane-tiled).
    rows_needed = -(-total // _LANE)
    bm = min(_MAX_BLOCK_ROWS, ((rows_needed + 15) // 16) * 16)
    rows = -(-rows_needed // bm) * bm
    padded = rows * _LANE

    flat = jnp.ravel(x)
    if padded != total:
        flat = jnp.pad(flat, (0, padded - total))
    x2 = flat.reshape(rows, _LANE)
    seed_arr = jnp.asarray([seed], dtype=jnp.int32)

    out2 = pl.pallas_call(
        functools.partial(_gaussian_noise_kernel, sigma=float(sigma)),
        out_shape=jax.ShapeDtypeStruct((rows, _LANE), x.dtype),
        grid=(rows // bm,),
        in_specs=[
            pl.BlockSpec(memory_space=pltpu.MemorySpace.SMEM),   # seed scalar
            pl.BlockSpec((bm, _LANE), lambda i: (i, 0)),
        ],
        out_specs=pl.BlockSpec((bm, _LANE), lambda i: (i, 0)),
        compiler_params=pltpu.CompilerParams(
            dimension_semantics=("parallel",)),
        input_output_aliases={1: 0},    # reuse x2's HBM buffer for the output
        cost_estimate=pl.CostEstimate(
            flops=16 * padded,
            transcendentals=2 * padded,
            bytes_accessed=2 * padded * x.dtype.itemsize),
    )(seed_arr, x2)

    return out2.reshape(-1)[:total].reshape(orig_shape)


if __name__ == "__main__":
    key = jax.random.PRNGKey(0)
    x = jax.random.normal(key, (2, 4, 16, 16), dtype=jnp.float32)
    sigma = 0.1

    # Training mode: x + N(0, sigma^2)
    y_train = jax.block_until_ready(gaussian_noise(x, sigma, seed=42, training=True))
    assert y_train.shape == x.shape and y_train.dtype == x.dtype

    # Sanity: noise has roughly the right scale, ~zero mean, not identically zero.
    diff = y_train - x
    std = float(jnp.std(diff))
    mean = float(jnp.mean(diff))
    assert 0.05 < std < 0.2, f"unexpected noise std {std}"
    assert abs(mean) < 0.03, f"unexpected noise mean {mean}"

    # Different seed -> different noise.
    y_train2 = jax.block_until_ready(gaussian_noise(x, sigma, seed=7, training=True))
    assert not bool(jnp.all(y_train2 == y_train))

    # Eval mode: identity.
    y_eval = jax.block_until_ready(gaussian_noise(x, sigma, training=False))
    assert bool(jnp.all(y_eval == x))

    print("KERNEL_OK")
</pallas_src>

<mosaic_0001>
module attributes {stable_mosaic.version = 11 : i64} {
  func.func @_gaussian_noise_kernel(%arg0: i32, %arg1: memref<1xi32, #tpu.memory_space<smem>>, %arg2: memref<16x512xf32, #tpu.memory_space<vmem>>, %arg3: memref<16x512xf32, #tpu.memory_space<vmem>>) attributes {dimension_semantics = [#tpu.dimension_semantics<parallel>], iteration_bounds = array<i64: 1>, scalar_prefetch = 0 : i64, scratch_operands = 0 : i64, tpu.core_type = #tpu.core_type<tc>, window_params = [{transform_indices = @transform_0, window_bounds = array<i64: 1>}, {transform_indices = @transform_1, window_bounds = array<i64: 16, 512>}, {transform_indices = @transform_2, window_bounds = array<i64: 16, 512>}]} {
    %c0 = arith.constant 0 : index
    %0 = memref.load %arg1[%c0] : memref<1xi32, #tpu.memory_space<smem>>
    %c-1640531527_i32 = arith.constant -1640531527 : i32
    %1 = arith.muli %arg0, %c-1640531527_i32 : i32
    %2 = arith.xori %0, %1 : i32
    %c16_i32 = arith.constant 16 : i32
    %3 = arith.shrui %2, %c16_i32 : i32
    %4 = arith.xori %2, %3 : i32
    %c2146121005_i32 = arith.constant 2146121005 : i32
    %5 = arith.muli %4, %c2146121005_i32 : i32
    %c15_i32 = arith.constant 15 : i32
    %6 = arith.shrui %5, %c15_i32 : i32
    %7 = arith.xori %5, %6 : i32
    %c-2073254261_i32 = arith.constant -2073254261 : i32
    %8 = arith.muli %7, %c-2073254261_i32 : i32
    %c16_i32_0 = arith.constant 16 : i32
    %9 = arith.shrui %8, %c16_i32_0 : i32
    %10 = arith.xori %8, %9 : i32
    %11 = tpu.iota {dimensions = array<i32: 0>} : vector<8x512xi32>
    %12 = tpu.iota {dimensions = array<i32: 1>} : vector<8x512xi32>
    %c512_i32 = arith.constant 512 : i32
    %13 = vector.broadcast %c512_i32 : i32 to vector<8x512xi32>
    %14 = arith.muli %11, %13 : vector<8x512xi32>
    %15 = arith.addi %14, %12 : vector<8x512xi32>
    %c2_i32 = arith.constant 2 : i32
    %16 = vector.broadcast %c2_i32 : i32 to vector<8x512xi32>
    %17 = arith.muli %15, %16 : vector<8x512xi32>
    %c-1640531527_i32_1 = arith.constant -1640531527 : i32
    %18 = vector.broadcast %c-1640531527_i32_1 : i32 to vector<8x512xi32>
    %19 = arith.muli %17, %18 : vector<8x512xi32>
    %20 = vector.broadcast %10 : i32 to vector<8x512xi32>
    %21 = arith.addi %19, %20 : vector<8x512xi32>
    %c16_i32_2 = arith.constant 16 : i32
    %22 = vector.broadcast %c16_i32_2 : i32 to vector<8x512xi32>
    %23 = arith.shrui %21, %22 : vector<8x512xi32>
    %24 = arith.xori %21, %23 : vector<8x512xi32>
    %c2146121005_i32_3 = arith.constant 2146121005 : i32
    %25 = vector.broadcast %c2146121005_i32_3 : i32 to vector<8x512xi32>
    %26 = arith.muli %24, %25 : vector<8x512xi32>
    %c15_i32_4 = arith.constant 15 : i32
    %27 = vector.broadcast %c15_i32_4 : i32 to vector<8x512xi32>
    %28 = arith.shrui %26, %27 : vector<8x512xi32>
    %29 = arith.xori %26, %28 : vector<8x512xi32>
    %c-2073254261_i32_5 = arith.constant -2073254261 : i32
    %30 = vector.broadcast %c-2073254261_i32_5 : i32 to vector<8x512xi32>
    %31 = arith.muli %29, %30 : vector<8x512xi32>
    %c16_i32_6 = arith.constant 16 : i32
    %32 = vector.broadcast %c16_i32_6 : i32 to vector<8x512xi32>
    %33 = arith.shrui %31, %32 : vector<8x512xi32>
    %34 = arith.xori %31, %33 : vector<8x512xi32>
    %c1_i32 = arith.constant 1 : i32
    %35 = vector.broadcast %c1_i32 : i32 to vector<8x512xi32>
    %36 = arith.addi %17, %35 : vector<8x512xi32>
    %c-1640531527_i32_7 = arith.constant -1640531527 : i32
    %37 = vector.broadcast %c-1640531527_i32_7 : i32 to vector<8x512xi32>
    %38 = arith.muli %36, %37 : vector<8x512xi32>
    %39 = vector.broadcast %10 : i32 to vector<8x512xi32>
    %40 = arith.addi %38, %39 : vector<8x512xi32>
    %c16_i32_8 = arith.constant 16 : i32
    %41 = vector.broadcast %c16_i32_8 : i32 to vector<8x512xi32>
    %42 = arith.shrui %40, %41 : vector<8x512xi32>
    %43 = arith.xori %40, %42 : vector<8x512xi32>
    %c2146121005_i32_9 = arith.constant 2146121005 : i32
    %44 = vector.broadcast %c2146121005_i32_9 : i32 to vector<8x512xi32>
    %45 = arith.muli %43, %44 : vector<8x512xi32>
    %c15_i32_10 = arith.constant 15 : i32
    %46 = vector.broadcast %c15_i32_10 : i32 to vector<8x512xi32>
    %47 = arith.shrui %45, %46 : vector<8x512xi32>
    %48 = arith.xori %45, %47 : vector<8x512xi32>
    %c-2073254261_i32_11 = arith.constant -2073254261 : i32
    %49 = vector.broadcast %c-2073254261_i32_11 : i32 to vector<8x512xi32>
    %50 = arith.muli %48, %49 : vector<8x512xi32>
    %c16_i32_12 = arith.constant 16 : i32
    %51 = vector.broadcast %c16_i32_12 : i32 to vector<8x512xi32>
    %52 = arith.shrui %50, %51 : vector<8x512xi32>
    %53 = arith.xori %50, %52 : vector<8x512xi32>
    %c9_i32 = arith.constant 9 : i32
    %54 = vector.broadcast %c9_i32 : i32 to vector<8x512xi32>
    %55 = arith.shrui %34, %54 : vector<8x512xi32>
    %c1065353216_i32 = arith.constant 1065353216 : i32
    %56 = vector.broadcast %c1065353216_i32 : i32 to vector<8x512xi32>
    %57 = arith.ori %55, %56 : vector<8x512xi32>
    %58 = tpu.bitcast %57 : vector<8x512xi32> -> vector<8x512xf32>
    %cst = arith.constant 1.000000e+00 : f32
    %59 = vector.broadcast %cst : f32 to vector<8x512xf32>
    %60 = arith.subf %58, %59 : vector<8x512xf32>
    %cst_13 = arith.constant 1.000000e+00 : f32
    %61 = vector.broadcast %cst_13 : f32 to vector<8x512xf32>
    %62 = arith.subf %61, %60 : vector<8x512xf32>
    %c9_i32_14 = arith.constant 9 : i32
    %63 = vector.broadcast %c9_i32_14 : i32 to vector<8x512xi32>
    %64 = arith.shrui %53, %63 : vector<8x512xi32>
    %c1065353216_i32_15 = arith.constant 1065353216 : i32
    %65 = vector.broadcast %c1065353216_i32_15 : i32 to vector<8x512xi32>
    %66 = arith.ori %64, %65 : vector<8x512xi32>
    %67 = tpu.bitcast %66 : vector<8x512xi32> -> vector<8x512xf32>
    %cst_16 = arith.constant 1.000000e+00 : f32
    %68 = vector.broadcast %cst_16 : f32 to vector<8x512xf32>
    %69 = arith.subf %67, %68 : vector<8x512xf32>
    %70 = math.log %62 : vector<8x512xf32>
    %cst_17 = arith.constant -2.000000e+00 : f32
    %71 = vector.broadcast %cst_17 : f32 to vector<8x512xf32>
    %72 = arith.mulf %71, %70 : vector<8x512xf32>
    %73 = math.sqrt %72 : vector<8x512xf32>
    %cst_18 = arith.constant 6.28318548 : f32
    %74 = vector.broadcast %cst_18 : f32 to vector<8x512xf32>
    %75 = arith.mulf %74, %69 : vector<8x512xf32>
    %76 = math.cos %75 : vector<8x512xf32>
    %77 = arith.mulf %73, %76 : vector<8x512xf32>
    %78 = math.sin %75 : vector<8x512xf32>
    %79 = arith.mulf %73, %78 : vector<8x512xf32>
    %c0_19 = arith.constant 0 : index
    %c0_20 = arith.constant 0 : index
    %80 = vector.load %arg2[%c0_19, %c0_20] : memref<16x512xf32, #tpu.memory_space<vmem>>, vector<8x512xf32>
    %c8 = arith.constant 8 : index
    %c0_21 = arith.constant 0 : index
    %81 = vector.load %arg2[%c8, %c0_21] : memref<16x512xf32, #tpu.memory_space<vmem>>, vector<8x512xf32>
    %cst_22 = arith.constant 1.000000e-01 : f32
    %82 = vector.broadcast %cst_22 : f32 to vector<8x512xf32>
    %83 = arith.mulf %82, %77 : vector<8x512xf32>
    %84 = arith.addf %80, %83 : vector<8x512xf32>
    %c0_23 = arith.constant 0 : index
    %c0_24 = arith.constant 0 : index
    %85 = vector.load %arg3[%c0_23, %c0_24] : memref<16x512xf32, #tpu.memory_space<vmem>>, vector<8x512xf32>
    tpu.vector_store %arg3[%c0_23, %c0_24], %84 {strides = array<i32>} : memref<16x512xf32, #tpu.memory_space<vmem>>, vector<8x512xf32>,
    %cst_25 = arith.constant 1.000000e-01 : f32
    %86 = vector.broadcast %cst_25 : f32 to vector<8x512xf32>
    %87 = arith.mulf %86, %79 : vector<8x512xf32>
    %88 = arith.addf %81, %87 : vector<8x512xf32>
    %c8_26 = arith.constant 8 : index
    %c0_27 = arith.constant 0 : index
    %89 = vector.load %arg3[%c8_26, %c0_27] : memref<16x512xf32, #tpu.memory_space<vmem>>, vector<8x512xf32>
    tpu.vector_store %arg3[%c8_26, %c0_27], %88 {strides = array<i32>} : memref<16x512xf32, #tpu.memory_space<vmem>>, vector<8x512xf32>,
    return
  }
  func.func @transform_0(%arg0: i32) -> i32 {
    %c0_i32 = arith.constant 0 : i32
    %c0_i32_0 = arith.constant 0 : i32
    return %c0_i32 : i32
  }
  func.func @transform_1(%arg0: i32) -> (i32, i32) {
    %c0_i32 = arith.constant 0 : i32
    %c0_i32_0 = arith.constant 0 : i32
    return %arg0, %c0_i32 : i32, i32
  }
  func.func @transform_2(%arg0: i32) -> (i32, i32) {
    %c0_i32 = arith.constant 0 : i32
    %c0_i32_0 = arith.constant 0 : i32
    return %arg0, %c0_i32 : i32, i32
  }
}

</mosaic_0001>

<bundles_post_ra>
// kernel: tpu_custom_call.1
= control target key start
LH: loop header
LB: loop body
LE: loop exit
PB: predicated region body
PF: predicated region fallthrough
CT: control target
= control target key end

     0   :  { %8 = vsyncpa [#allocation4], 0  ;;  %s1711_s0 = inlined_call_operand.<no memory space> [shape: s32[1], index: 0, kind: input, shape index: {}]   ;;  %s1712_s1 = inlined_call_operand.hbm [shape: f32[16,512], index: 1, kind: input, shape index: {}, may-alias: {1,2}]   ;;  %s1713_s2 = inlined_call_operand.hbm [shape: f32[16,512], index: 2, kind: output, shape index: {}, may-alias: {1,2}]  }
   0x1   :  { %9 = vsyncpa [#allocation5], 0  ;;  %s1250_s9 = smov [#allocation3]   ;;  %s1202_s13 = scalar_lea.hbm %s1712_s1, 1024 }
   0x2   :  { %s17_s10 = sshll.u32 %s1250_s9, 4  ;;  %p1203_p0 = scmp.ne.s32.totalorder %s1712_s1, %s1202_s13  ;;  %s18_s10 = int_to_ptr.vmem [resolvable:$true] %s17_s10 }
   0x3   :  { %p1206_p1 = scmp.lt.u32.totalorder %s1202_s13, %s1712_s1 }
   0x5   :  { %p1208_p2 = pnand %p1206_p1, %p1203_p0 }
   0x7   :  { %1211 = shalt.err (!%p1208_p2)
}
   0x8   :  { %s1212_s18 = scalar_lea.vmem %s18_s10, 1024  ;;  %p1217_p4 = scmp.lt.s32.totalorder %s18_s10, %s18_s10 }
   0x9   :  { %p1213_p3 = scmp.ne.s32.totalorder %s18_s10, %s1212_s18  ;;  %p1218_p5 = scmp.lt.s32.totalorder %s1212_s18, %s1212_s18 }
   0xb   :  { %p1219_p6 = por %p1218_p5, %p1217_p4 }
   0xd   :  { %p1220_p7 = pnand %p1219_p6, %p1213_p3 }
   0xf   :  { %1223 = shalt.err (!%p1220_p7)
}
  0x10   :  { %s1251_s19 = smov 512   ;;  %s1252_s20 = smov 32  }
  0x11   :  { %23 = dma.hbm_to_vmem [thread:$0]  %s1712_s1, 1024, %s18_s10, [#allocation4], %s1251_s19, %s1251_s19, %s1252_s20  }
  0x12   :  { %1246 = dma.done.wait [#allocation4], 1024  }
  0x13   :  { %1247 = vsyncadd [#allocation4], 4294966272  ;;  %s30_s25 = sshrl.u32 %s1711_s0, 16  ;;  %v38_v0 = vlaneseq }
  0x14   :  { %s31_s28 = sxor.u32 %s30_s25, %s1711_s0  ;;  %s1259_s0 = smov [#allocation6]  }
  0x15   :  { %s32_s29 = smul.u32 2146121005, %s31_s28  ;;  %v39_v1 = vshrl.u32 %v38_v0, 7  ;;  %v41_v2 = vand.u32 127, %v38_v0  ;;  %s1092_s6 = sshll.u32 %s1259_s0, 4  ;;  %s1093_s6 = int_to_ptr.vmem [resolvable:$true] %s1092_s6 }
  0x16   :  { %s1224_s7 = scalar_lea.vmem %s1093_s6, 1024  ;;  %p1229_p9 = scmp.lt.s32.totalorder %s1093_s6, %s1093_s6 }
  0x17   :  { %s33_s30 = sshrl.u32 %s32_s29, 15  ;;  %v42_v3 = vadd.s32 128, %v41_v2  ;;  %v43_v4 = vadd.s32 256, %v41_v2  ;;  %v44_v5 = vadd.s32 384, %v41_v2  ;;  %v45_v6 = vmul.u32 512, %v39_v1  ;;  %p1225_p8 = scmp.ne.s32.totalorder %s1093_s6, %s1224_s7 }
  0x18   :  { %s34_s1 = sxor.u32 %s33_s30, %s32_s29  ;;  %p1230_p10 = scmp.lt.s32.totalorder %s1224_s7, %s1224_s7 }
  0x19   :  { %s35_s3 = smul.u32 2221713035, %s34_s1  ;;  %v46_v7 = vadd.s32 %v45_v6, %v41_v2  ;;  %v47_v8 = vadd.s32 %v45_v6, %v42_v3  ;;  %v48_v9 = vadd.s32 %v45_v6, %v43_v4  ;;  %v49_v10 = vadd.s32 %v45_v6, %v44_v5 }
  0x1a   :  { %p1231_p11 = por %p1230_p10, %p1229_p9 }
  0x1b   :  { %s36_s4 = sshrl.u32 %s35_s3, 16  ;;  %v50_v11 = vmul.u32 2, %v46_v7  ;;  %v51_v12 = vmul.u32 2, %v47_v8 }
  0x1c   :  { %s37_s5 = sxor.u32 %s36_s4, %s35_s3  ;;  %v52_v13 = vmul.u32 2, %v48_v9  ;;  %v53_v14 = vmul.u32 2, %v49_v10  ;;  %p1232_p12 = pnand %p1231_p11, %p1225_p8 }
  0x1d   :  { %v54_v15 = vmul.u32 2654435769, %v50_v11  ;;  %v55_v16 = vmul.u32 2654435769, %v51_v12  ;;  %v58_v17 = vstv %s37_s5  ;;  %v95_v18 = vadd.s32 1, %v50_v11 }
  0x1e   :  { %v56_v19 = vmul.u32 2654435769, %v52_v13  ;;  %v57_v20 = vmul.u32 2654435769, %v53_v14  ;;  %v96_v21 = vadd.s32 1, %v51_v12  ;;  %v97_v22 = vadd.s32 1, %v52_v13 }
  0x1f   :  { %v59_v23 = vadd.s32 %v58_v17, %v54_v15  ;;  %v60_v24 = vadd.s32 %v58_v17, %v55_v16  ;;  %v98_v25 = vadd.s32 1, %v53_v14  ;;  %v99_v26 = vmul.u32 2654435769, %v95_v18 }
  0x20   :  { %v61_v27 = vadd.s32 %v58_v17, %v56_v19  ;;  %v62_v28 = vadd.s32 %v58_v17, %v57_v20  ;;  %v100_v29 = vmul.u32 2654435769, %v96_v21  ;;  %v101_v30 = vmul.u32 2654435769, %v97_v22 }
  0x21   :  { %v63_v31 = vshrl.u32 %v59_v23, 16  ;;  %v64_v32 = vshrl.u32 %v60_v24, 16  ;;  %v102_v33 = vmul.u32 2654435769, %v98_v25  ;;  %v103_v34 = vadd.s32 %v99_v26, %v58_v17 }
  0x22   :  { %v65_v35 = vshrl.u32 %v61_v27, 16  ;;  %v66_v36 = vshrl.u32 %v62_v28, 16  ;;  %v104_v37 = vadd.s32 %v100_v29, %v58_v17  ;;  %v105_v38 = vadd.s32 %v101_v30, %v58_v17 }
  0x23   :  { %v67_v39 = vxor.u32 %v63_v31, %v59_v23  ;;  %v68_v40 = vxor.u32 %v64_v32, %v60_v24  ;;  %v106_v41 = vadd.s32 %v102_v33, %v58_v17  ;;  %v107_v42 = vshrl.u32 %v103_v34, 16 }
  0x24   :  { %v69_v43 = vxor.u32 %v65_v35, %v61_v27  ;;  %v70_v44 = vxor.u32 %v66_v36, %v62_v28  ;;  %v108_v45 = vshrl.u32 %v104_v37, 16  ;;  %v109_v46 = vshrl.u32 %v105_v38, 16 }
  0x25   :  { %v71_v47 = vmul.u32 2146121005, %v67_v39  ;;  %v72_v48 = vmul.u32 2146121005, %v68_v40  ;;  %v110_v49 = vshrl.u32 %v106_v41, 16  ;;  %v111_v50 = vxor.u32 %v107_v42, %v103_v34 }
  0x26   :  { %v73_v51 = vmul.u32 2146121005, %v69_v43  ;;  %v74_v52 = vmul.u32 2146121005, %v70_v44  ;;  %v112_v53 = vxor.u32 %v108_v45, %v104_v37  ;;  %v113_v54 = vxor.u32 %v109_v46, %v105_v38 }
  0x27   :  { %v75_v55 = vshrl.u32 %v71_v47, 15  ;;  %v76_v56 = vshrl.u32 %v72_v48, 15  ;;  %v114_v57 = vxor.u32 %v110_v49, %v106_v41  ;;  %v115_v58 = vmul.u32 2146121005, %v111_v50 }
  0x28   :  { %v77_v59 = vshrl.u32 %v73_v51, 15  ;;  %v116_v60 = vmul.u32 2146121005, %v112_v53  ;;  %v117_v61 = vmul.u32 2146121005, %v113_v54  ;;  %v78_v62 = vshrl.u32 %v74_v52, 15 }
  0x29   :  { %v79_v63 = vxor.u32 %v75_v55, %v71_v47  ;;  %v80_v0 = vxor.u32 %v76_v56, %v72_v48  ;;  %v119_v1 = vshrl.u32 %v115_v58, 15  ;;  %v118_v3 = vmul.u32 2146121005, %v114_v57 }
  0x2a   :  { %v81_v2 = vxor.u32 %v77_v59, %v73_v51  ;;  %v120_v4 = vshrl.u32 %v116_v60, 15  ;;  %v121_v5 = vshrl.u32 %v117_v61, 15  ;;  %v82_v14 = vxor.u32 %v78_v62, %v74_v52 }
  0x2b   :  { %v83_v6 = vmul.u32 2221713035, %v79_v63  ;;  %v123_v7 = vxor.u32 %v119_v1, %v115_v58  ;;  %v84_v8 = vmul.u32 2221713035, %v80_v0  ;;  %v122_v15 = vshrl.u32 %v118_v3, 15 }
  0x2c   :  { %v124_v9 = vxor.u32 %v120_v4, %v116_v60  ;;  %v125_v10 = vxor.u32 %v121_v5, %v117_v61  ;;  %v85_v11 = vmul.u32 2221713035, %v81_v2  ;;  %v86_v25 = vmul.u32 2221713035, %v82_v14 }
  0x2d   :  { %v87_v12 = vshrl.u32 %v83_v6, 16  ;;  %v127_v13 = vmul.u32 2221713035, %v123_v7  ;;  %v88_v22 = vshrl.u32 %v84_v8, 16  ;;  %v126_v27 = vxor.u32 %v122_v15, %v118_v3 }
  0x2e   :  { %v128_v16 = vmul.u32 2221713035, %v124_v9  ;;  %v129_v17 = vmul.u32 2221713035, %v125_v10  ;;  %v89_v26 = vshrl.u32 %v85_v11, 16  ;;  %v90_v35 = vshrl.u32 %v86_v25, 16 }
  0x2f   :  { %v91_v18 = vxor.u32 %v87_v12, %v83_v6  ;;  %v131_v19 = vshrl.u32 %v127_v13, 16  ;;  %v92_v32 = vxor.u32 %v88_v22, %v84_v8  ;;  %v130_v37 = vmul.u32 2221713035, %v126_v27 }
  0x30   :  { %v132_v20 = vshrl.u32 %v128_v16, 16  ;;  %v133_v21 = vshrl.u32 %v129_v17, 16  ;;  %v93_v36 = vxor.u32 %v89_v26, %v85_v11  ;;  %v94_v45 = vxor.u32 %v90_v35, %v86_v25 }
  0x31   :  { %v135_v23 = vxor.u32 %v131_v19, %v127_v13  ;;  %v139_v24 = vshrl.u32 %v91_v18, 9  ;;  %v140_v42 = vshrl.u32 %v92_v32, 9  ;;  %v134_v46 = vshrl.u32 %v130_v37, 16 }
  0x32   :  { %v136_v28 = vxor.u32 %v132_v20, %v128_v16  ;;  %v137_v30 = vxor.u32 %v133_v21, %v129_v17  ;;  %v141_v47 = vshrl.u32 %v93_v36, 9  ;;  %v142_v54 = vshrl.u32 %v94_v45, 9 }
  0x33   :  { %v159_v29 = vshrl.u32 %v135_v23, 9  ;;  %v143_v33 = vor.u32 1065353216, %v139_v24  ;;  %v144_v51 = vor.u32 1065353216, %v140_v42  ;;  %v138_v53 = vxor.u32 %v134_v46, %v130_v37 }
  0x34   :  { %v160_v31 = vshrl.u32 %v136_v28, 9  ;;  %v161_v40 = vshrl.u32 %v137_v30, 9  ;;  %v145_v55 = vor.u32 1065353216, %v141_v47  ;;  %v146_v61 = vor.u32 1065353216, %v142_v54 }
  0x35   :  { %v163_v34 = vor.u32 1065353216, %v159_v29  ;;  %v1104_v43 = vadd.f32 -1.0, %v143_v33  ;;  %v1105_v60 = vadd.f32 -1.0, %v144_v51  ;;  %v162_v63 = vshrl.u32 %v138_v53, 9 }
  0x36   :  { %v164_v38 = vor.u32 1065353216, %v160_v31  ;;  %v165_v49 = vor.u32 1065353216, %v161_v40  ;;  %v1106_v62 = vadd.f32 -1.0, %v145_v55  ;;  %v1306_v7 = vadd.f32 -1.0, %v146_v61 }
  0x37   :  { %v1108_v39 = vadd.f32 -1.0, %v163_v34  ;;  %v155_v52 = vsub.f32 1.0, %v1104_v43  ;;  %v156_v5 = vsub.f32 1.0, %v1105_v60  ;;  %v166_v9 = vor.u32 1065353216, %v162_v63 }
  0x38   :  { %v1109_v41 = vadd.f32 -1.0, %v164_v38  ;;  %v1110_v58 = vadd.f32 -1.0, %v165_v49  ;;  %v157_v8 = vsub.f32 1.0, %v1106_v62  ;;  %v158_v16 = vsub.f32 1.0, %v1306_v7 }
  0x39   :  { %v1296_v44 = vmul.f32 6.2831855, %v1108_v39  ;;  %1170 = vlog2.f32 %v155_v52  ;;  %v1111_v17 = vadd.f32 -1.0, %v166_v9  ;;  %v1253_v24 = vmov 683565275  }
  0x3a   :  { %v1298_v48 = vmul.f32 6.2831855, %v1109_v41  ;;  %v1304_v4 = vmul.f32 6.2831855, %v1110_v58  ;;  %1172 = vlog2.f32 %v156_v5  ;;  %v1254_v28 = vmov 2475754826  }
  0x3b   :  { %v222_v50 = vand.u32 2139095040, %v1296_v44  ;;  %v219_v1 = vand.u32 2147483647, %v1296_v44  ;;  %1174 = vlog2.f32 %v157_v8  ;;  %v1255_v30 = vmov 2131351028  }
  0x3c   :  { %v325_v57 = vand.u32 2139095040, %v1298_v48  ;;  %v322_v2 = vand.u32 2147483647, %v1298_v48  ;;  %v425_v14 = vand.u32 2147483647, %v1304_v4  ;;  %v428_v15 = vand.u32 2139095040, %v1304_v4 }
  0x3d   :  { %v223_v56 = vshrl.u32 %v222_v50, 23  ;;  %v226_v10 = vand.u32 8388607, %v219_v1  ;;  %v1256_v32 = vmov 2102212464   ;;  %1176 = vlog2.f32 %v158_v16 }
  0x3e   :  { %v326_v3 = vshrl.u32 %v325_v57, 23  ;;  %v1312_v12 = vand.u32 8388607, %v322_v2  ;;  %v429_v26 = vshrl.u32 %v428_v15, 23  ;;  %v1321_v27 = vand.u32 8388607, %v425_v14 }
  0x3f   :  { %v1112_v59 = vadd.s32 4294967169, %v223_v56  ;;  %v227_v19 = vor.u32 8388608, %v226_v10  ;;  %v1257_v34 = vmov 920167782   ;;  %v1258_v41 = vmov 1326507024  }
  0x40   :  { %v1116_v11 = vadd.s32 4294967169, %v326_v3  ;;  %v330_v21 = vor.u32 8388608, %v1312_v12  ;;  %v1120_v58 = vadd.s32 4294967169, %v429_v26 }
  0x41   :  { %v229_v0 = vadd.s32 1, %v1112_v59  ;;  %v267_v57 = vshll.u32 %v227_v19, 8 }
  0x42   :  { %v332_v22 = vadd.s32 1, %v1116_v11  ;;  %v435_v12 = vadd.s32 1, %v1120_v58 }
  0x43   :  { %vm230_vm0 = vcmp.gt.s32.totalorder %v229_v0, 0  ;;  %v1171_v18 = vpop.eup %1170 }
  0x44   :  { %v231_v6 = vsel %vm230_vm0, %v229_v0, 0  ;;  %v176_v36 = vmul.f32 0.6931472, %v1171_v18  ;;  %vm333_vm2 = vcmp.gt.s32.totalorder %v332_v22, 0  ;;  %v1173_v54 = vpop.eup %1172  ;;  %v1336_v0 = vmul.f32 6.2831855, %v1111_v17 }
  0x45   :  { %v233_v13 = vand.u32 31, %v231_v6  ;;  %v232_v20 = vshrl.u32 %v231_v6, 5  ;;  %v1175_v59 = vpop.eup %1174  ;;  %v334_v6 = vsel %vm333_vm2, %v332_v22, 0  ;;  %v1353_v17 = vshll.u32 %v330_v21, 8 }
  0x46   :  { %v1341_v7 = vmul.f32 -2.0, %v176_v36  ;;  %v1343_v8 = vshrl.u32 %v334_v6, 5  ;;  %v433_v18 = vor.u32 8388608, %v1321_v27  ;;  %v178_v19 = vmul.f32 0.6931472, %v1173_v54 }
  0x47   :  { %v234_v23 = vsub.s32 32, %v233_v13  ;;  %v236_v25 = vshll.u32 %v1253_v24, %v233_v13  ;;  %v239_v29 = vshll.u32 %v1254_v28, %v233_v13  ;;  %v242_v31 = vshll.u32 %v1255_v30, %v233_v13 }
  0x48   :  { %v245_v33 = vshll.u32 %v1256_v32, %v233_v13  ;;  %v248_v35 = vshll.u32 %v1257_v34, %v233_v13  ;;  %vm251_vm1 = vcmp.lt.s32.totalorder %v232_v20, 1  ;;  %vm253_vm3 = vcmp.lt.s32.totalorder %v232_v20, 3 }
  0x49   :  { %v237_v37 = vshrl.u32 %v1254_v28, %v234_v23  ;;  %v240_v38 = vshrl.u32 %v1255_v30, %v234_v23  ;;  %v243_v39 = vshrl.u32 %v1256_v32, %v234_v23  ;;  %v246_v40 = vshrl.u32 %v1257_v34, %v234_v23 }
  0x4a   :  { %v249_v42 = vshrl.u32 %v1258_v41, %v234_v23  ;;  %v235_v43 = vshrl.u32 %v1253_v24, %v234_v23  ;;  %vm254_vm4 = vcmp.lt.s32.totalorder %v232_v20, 4  ;;  %vm252_vm5 = vcmp.lt.s32.totalorder %v232_v20, 2 }
  0x4b   :  { %v238_v45 = vor.u32 %v237_v37, %v236_v25  ;;  %v241_v46 = vor.u32 %v240_v38, %v239_v29  ;;  %v244_v47 = vor.u32 %v243_v39, %v242_v31  ;;  %v247_v49 = vor.u32 %v246_v40, %v245_v33 }
  0x4c   :  { %v250_v50 = vor.u32 %v249_v42, %v248_v35  ;;  %v180_v16 = vmul.f32 0.6931472, %v1175_v59  ;;  %v336_v22 = vand.u32 31, %v334_v6  ;;  %v531_v23 = vand.u32 2139095040, %v1336_v0 }
  0x4d   :  { %v256_v51 = vsel %vm254_vm4, %v244_v47, 2102212464  ;;  %v259_v52 = vsel %vm251_vm1, %v238_v45, %v241_v46  ;;  %v263_v53 = vsel %vm251_vm1, %v241_v46, %v244_v47  ;;  %v260_v55 = vsel %vm254_vm4, %v247_v49, 920167782 }
  0x4e   :  { %v264_v56 = vsel %vm254_vm4, %v250_v50, 1326507024  ;;  %v255_v60 = vsel %vm251_vm1, %v235_v43, %v238_v45  ;;  %v257_v61 = vsel %vm253_vm3, %v241_v46, %v256_v51  ;;  %v261_v62 = vsel %vm253_vm3, %v244_v47, %v260_v55 }
  0x4f   :  { %v265_v63 = vsel %vm253_vm3, %v247_v49, %v264_v56  ;;  %v262_v3 = vsel %vm252_vm5, %v259_v52, %v261_v62  ;;  %v258_v9 = vsel %vm252_vm5, %v255_v60, %v257_v61  ;;  %1178 = vrsqrt.f32 %v1341_v7  ;;  %v1375_v49 = vpop.eup %1176 }
  0x50   :  { %v266_v5 = vsel %vm252_vm5, %v263_v53, %v265_v63  ;;  %v1349_v13 = vmul.u32.u64.low %v267_v57, %v262_v3  ;;  %v1350_v15 = vmul.u32.u64.high %v267_v57, %v262_v3, %v1349_v13  ;;  %v274_v20 = vmul.u32 %v267_v57, %v258_v9 }
  0x51   :  { %v1346_v10 = vmul.u32.u64.low %v267_v57, %v266_v5  ;;  %v1347_v11 = vmul.u32.u64.high %v267_v57, %v266_v5, %v1346_v10  ;;  %vm354_vm6 = vcmp.lt.s32.totalorder %v1343_v8, 1  ;;  %vm357_vm7 = vcmp.lt.s32.totalorder %v1343_v8, 4 }
  0x52   :  { %v337_v25 = vsub.s32 32, %v336_v22  ;;  %v339_v21 = vshll.u32 %v1253_v24, %v336_v22  ;;  %vm436_vm9 = vcmp.gt.s32.totalorder %v435_v12, 0  ;;  %v277_v26 = vadd.s32 1, %v1350_v15 }
  0x53   :  { %vm276_vm8 = vc.u32 %v1347_v11, %v1349_v13  ;;  %v342_v27 = vshll.u32 %v1254_v28, %v336_v22  ;;  %v345_v29 = vshll.u32 %v1255_v30, %v336_v22  ;;  %v348_v31 = vshll.u32 %v1256_v32, %v336_v22 }
  0x54   :  { %v338_v33 = vshrl.u32 %v1253_v24, %v337_v25  ;;  %v340_v35 = vshrl.u32 %v1254_v28, %v337_v25  ;;  %v343_v36 = vshrl.u32 %v1255_v30, %v337_v25  ;;  %v346_v37 = vshrl.u32 %v1256_v32, %v337_v25 }
  0x55   :  { %v278_v38 = vsel %vm276_vm8, %v277_v26, %v1350_v15  ;;  %v349_v39 = vshrl.u32 %v1257_v34, %v337_v25  ;;  %v351_v40 = vshll.u32 %v1257_v34, %v336_v22  ;;  %v352_v42 = vshrl.u32 %v1258_v41, %v337_v25 }
  0x56   :  { %v279_v43 = vadd.s32 %v278_v38, %v274_v20  ;;  %v341_v45 = vor.u32 %v340_v35, %v339_v21  ;;  %v344_v46 = vor.u32 %v343_v36, %v342_v27  ;;  %v347_v47 = vor.u32 %v346_v37, %v345_v29 }
  0x57   :  { %v350_v50 = vor.u32 %v349_v39, %v348_v31  ;;  %v353_v51 = vor.u32 %v352_v42, %v351_v40  ;;  %vm355_vm10 = vcmp.lt.s32.totalorder %v1343_v8, 2  ;;  %vm356_vm11 = vcmp.lt.s32.totalorder %v1343_v8, 3 }
  0x58   :  { %v280_v52 = vadd.s32 536870912, %v279_v43  ;;  %v359_v53 = vsel %vm357_vm7, %v347_v47, 2102212464  ;;  %v362_v54 = vsel %vm354_vm6, %v341_v45, %v344_v46  ;;  %v437_v55 = vsel %vm436_vm9, %v435_v12, 0 }
  0x59   :  { %v358_v56 = vsel %vm354_vm6, %v338_v33, %v341_v45  ;;  %v363_v57 = vsel %vm357_vm7, %v350_v50, 920167782  ;;  %v366_v58 = vsel %vm354_vm6, %v344_v46, %v347_v47  ;;  %v367_v59 = vsel %vm357_vm7, %v353_v51, 1326507024  ;;  %v1179_v3 = vpop.eup %1178 }
  0x5a   :  { %v1392_v60 = vshrl.u32 %v280_v52, 30  ;;  %v360_v61 = vsel %vm356_vm11, %v344_v46, %v359_v53  ;;  %v364_v62 = vsel %vm356_vm11, %v347_v47, %v363_v57  ;;  %v368_v63 = vsel %vm356_vm11, %v350_v50, %v367_v59 }
  0x5b   :  { %v365_v5 = vsel %vm355_vm10, %v362_v54, %v364_v62  ;;  %v369_v6 = vsel %vm355_vm10, %v366_v58, %v368_v63  ;;  %v1398_v9 = vshll.u32 %v433_v18, 8  ;;  %v528_v10 = vand.u32 2147483647, %v1336_v0 }
  0x5c   :  { %v1401_v12 = vmul.f32 -2.0, %v178_v19  ;;  %v282_v15 = vshll.u32 %v1392_v60, 30  ;;  %v1405_v22 = vmul.u32.u64.low %v1353_v17, %v369_v6  ;;  %v1406_v20 = vmul.u32.u64.high %v1353_v17, %v369_v6, %v1405_v22 }
  0x5d   :  { %v361_v25 = vsel %vm355_vm10, %v358_v56, %v360_v61  ;;  %v1411_v21 = vmul.u32.u64.low %v1353_v17, %v365_v5  ;;  %v1412_v26 = vmul.u32.u64.high %v1353_v17, %v365_v5, %v1411_v21  ;;  %v439_v18 = vand.u32 31, %v437_v55 }
  0x5e   :  { %v1415_v27 = vmul.f32 -2.0, %v180_v16  ;;  %v1417_v29 = vsub.s32 %v279_v43, %v282_v15  ;;  %v1419_v19 = vshrl.u32 %v437_v55, 5  ;;  %v532_v31 = vshrl.u32 %v531_v23, 23 }
  0x5f   :  { %v192_v33 = vand.u32 2147483648, %v1341_v7  ;;  %v440_v35 = vsub.s32 32, %v439_v18  ;;  %v442_v36 = vshll.u32 %v1253_v24, %v439_v18  ;;  %v445_v8 = vshll.u32 %v1254_v28, %v439_v18 }
  0x60   :  { %1180 = vrsqrt.f32 %v1401_v12  ;;  %v285_v37 = vsub.s32 0, %v1417_v29  ;;  %v377_v38 = vmul.u32 %v1353_v17, %v361_v25  ;;  %vm379_vm12 = vc.u32 %v1406_v20, %v1411_v21 }
  0x61   :  { %v1430_v16 = vmul.f32 %v1179_v3, %v1341_v7  ;;  %v380_v23 = vadd.s32 1, %v1412_v26  ;;  %v443_v39 = vshrl.u32 %v1254_v28, %v440_v35  ;;  %v446_v40 = vshrl.u32 %v1255_v30, %v440_v35 }
  0x62   :  { %v275_v42 = vadd.s32 %v1349_v13, %v1347_v11  ;;  %v1113_v43 = vmin.u32 %v285_v37, %v1417_v29  ;;  %vm457_vm13 = vcmp.lt.s32.totalorder %v1419_v19, 1  ;;  %v1439_v17 = vadd.s32 4294967169, %v532_v31 }
  0x63   :  { %v381_v45 = vsel %vm379_vm12, %v380_v23, %v1412_v26  ;;  %v444_v46 = vor.u32 %v443_v39, %v442_v36  ;;  %v447_v47 = vor.u32 %v446_v40, %v445_v8  ;;  %v448_v50 = vshll.u32 %v1255_v30, %v439_v18 }
  0x64   :  { %v287_v51 = vclz %v1113_v43  ;;  %v382_v52 = vadd.s32 %v381_v45, %v377_v38  ;;  %v449_v53 = vshrl.u32 %v1256_v32, %v440_v35  ;;  %v451_v54 = vshll.u32 %v1256_v32, %v439_v18 }
  0x65   :  { %vm189_vm14 = vcmp.eq.f32.partialorder %v1341_v7, inf  ;;  %v452_v11 = vshrl.u32 %v1257_v34, %v440_v35  ;;  %v454_v13 = vshll.u32 %v1257_v34, %v439_v18  ;;  %v455_v55 = vshrl.u32 %v1258_v41, %v440_v35 }
  0x66   :  { %vm458_vm15 = vcmp.lt.s32.totalorder %v1419_v19, 2  ;;  %v1114_v56 = vadd.s32 4294967294, %v287_v51  ;;  %v383_v57 = vadd.s32 536870912, %v382_v52  ;;  %v450_v58 = vor.u32 %v449_v53, %v448_v50 }
  0x67   :  { %vm460_vm0 = vcmp.lt.s32.totalorder %v1419_v19, 4  ;;  %v441_v59 = vshrl.u32 %v1253_v24, %v440_v35  ;;  %v453_v61 = vor.u32 %v452_v11, %v451_v54  ;;  %v456_v62 = vor.u32 %v455_v55, %v454_v13 }
  0x68   :  { %vm459_vm1 = vcmp.lt.s32.totalorder %v1419_v19, 3  ;;  %vm191_vm2 = vcmp.eq.f32.partialorder %v1341_v7, 0.0  ;;  %vm221_vm3 = vcmp.lt.s32.totalorder %v1296_v44, 0  ;;  %vm1115_vm4 = vcmp.lt.s32.totalorder %v1114_v56, 0 }
  0x69   :  { %v384_v63 = vshrl.u32 %v383_v57, 30  ;;  %v462_v3 = vsel %vm460_vm0, %v450_v58, 2102212464  ;;  %v465_v5 = vsel %vm457_vm13, %v444_v46, %v447_v47  ;;  %v290_v6 = vsel %vm1115_vm4, 0, %v1114_v56 }
  0x6a   :  { %v466_v15 = vsel %vm460_vm0, %v453_v61, 920167782  ;;  %v469_v22 = vsel %vm457_vm13, %v447_v47, %v450_v58  ;;  %v470_v25 = vsel %vm460_vm0, %v456_v62, 1326507024  ;;  %v1181_v26 = vpop.eup %1180  ;;  %v291_v18 = vsub.s32 32, %v290_v6 }
  0x6b   :  { %v292_v31 = vshll.u32 %v1417_v29, %v290_v6  ;;  %v295_v35 = vsub.s32 4294967266, %v290_v6  ;;  %vm324_vm5 = vcmp.lt.s32.totalorder %v1298_v48, 0  ;;  %v385_v36 = vshll.u32 %v384_v63, 30 }
  0x6c   :  { %v461_v8 = vsel %vm457_vm13, %v441_v59, %v444_v46  ;;  %v463_v37 = vsel %vm459_vm1, %v447_v47, %v462_v3  ;;  %v467_v38 = vsel %vm459_vm1, %v450_v58, %v466_v15  ;;  %v471_v23 = vsel %vm459_vm1, %v453_v61, %v470_v25 }
  0x6d   :  { %vm1471_vm6 = vcmp.le.f32.partialorder %v219_v1, 0.7853982  ;;  %v293_v39 = vshrl.u32 %v275_v42, %v291_v18  ;;  %v296_v40 = vadd.s32 127, %v295_v35  ;;  %v1475_v43 = vsub.s32 %v382_v52, %v385_v36 }
  0x6e   :  { %v468_v45 = vsel %vm458_vm15, %v465_v5, %v467_v38  ;;  %v305_v46 = vsub.s32 4, %v1392_v60  ;;  %v472_v47 = vsel %vm458_vm15, %v469_v22, %v471_v23  ;;  %vm1489_vm7 = vcmp.le.f32.partialorder %v322_v2, 0.7853982 }
  0x6f   :  { %v1483_v50 = vmul.u32.u64.low %v1398_v9, %v468_v45  ;;  %v1484_v51 = vmul.u32.u64.high %v1398_v9, %v468_v45, %v1483_v50  ;;  %v294_v1 = vor.u32 %v293_v39, %v292_v31  ;;  %v297_v53 = vshll.u32 %v296_v40, 23 }
  0x70   :  { %v388_v52 = vsub.s32 0, %v1475_v43  ;;  %v464_v54 = vsel %vm458_vm15, %v461_v8, %v463_v37  ;;  %v199_v11 = vand.u32 2147483648, %v1401_v12  ;;  %v408_v13 = vsub.s32 4, %v384_v63 }
  0x71   :  { %v1498_v55 = vmul.u32.u64.low %v1398_v9, %v472_v47  ;;  %v1499_v56 = vmul.u32.u64.high %v1398_v9, %v472_v47, %v1498_v55  ;;  %v190_v2 = vsel %vm189_vm14, %v1341_v7, %v1430_v16  ;;  %v298_v57 = vor.u32 4788187, %v297_v53 }
  0x72   :  { %v301_v58 = vcvt.s32.f32 %v294_v1  ;;  %v1117_v59 = vmin.u32 %v388_v52, %v1475_v43  ;;  %1182 = vrsqrt.f32 %v1415_v27  ;;  %v306_v19 = vsel %vm221_vm3, %v305_v46, %v1392_v60 }
  0x73   :  { %v480_v61 = vmul.u32 %v1398_v9, %v464_v54  ;;  %v483_v62 = vadd.s32 1, %v1484_v51  ;;  %v299_v3 = vand.u32 2147483647, %v298_v57  ;;  %v535_v6 = vand.u32 8388607, %v528_v10 }
  0x74   :  { %v390_v5 = vclz %v1117_v59  ;;  %v538_v16 = vadd.s32 1, %v1439_v17  ;;  %v1519_v15 = vsel %vm191_vm2, %v192_v33, %v190_v2  ;;  %v1522_v22 = vmul.f32 %v1181_v26, %v1401_v12 }
  0x75   :  { %v409_v60 = vsel %vm324_vm5, %v408_v13, %v384_v63  ;;  %vm482_vm8 = vc.u32 %v1499_v56, %v1483_v50  ;;  %v302_v9 = vmul.f32 %v301_v58, %v299_v3  ;;  %v308_v17 = vsel %vm1471_vm6, 0, %v306_v19 }
  0x76   :  { %v1118_v25 = vadd.s32 4294967294, %v390_v5  ;;  %v484_v18 = vsel %vm482_vm8, %v483_v62, %v1484_v51  ;;  %vm539_vm9 = vcmp.gt.s32.totalorder %v538_v16, 0  ;;  %v378_v7 = vadd.s32 %v1411_v21, %v1406_v20 }
  0x77   :  { %v485_v33 = vadd.s32 %v484_v18, %v480_v61  ;;  %v540_v26 = vsel %vm539_vm9, %v538_v16, 0  ;;  %v303_v31 = vxor.u32 2147483648, %v302_v9  ;;  %v536_v35 = vor.u32 8388608, %v535_v6 }
  0x78   :  { %vm1119_vm10 = vcmp.lt.s32.totalorder %v1118_v25, 0  ;;  %v542_v63 = vand.u32 31, %v540_v26  ;;  %v1533_v36 = vand.u32 3, %v308_v17  ;;  %v411_v37 = vsel %vm1489_vm7, 0, %v409_v60 }
  0x79   :  { %v393_v8 = vsel %vm1119_vm10, 0, %v1118_v25  ;;  %v486_v38 = vadd.s32 536870912, %v485_v33  ;;  %v304_v23 = vsel %vm221_vm3, %v303_v31, %v302_v9  ;;  %v1543_v45 = vand.u32 3, %v411_v37 }
  0x7a   :  { %v394_v39 = vsub.s32 32, %v393_v8  ;;  %v395_v40 = vshll.u32 %v1475_v43, %v393_v8  ;;  %v398_v20 = vsub.s32 4294967266, %v393_v8  ;;  %v307_v21 = vsel %vm1471_vm6, %v1296_v44, %v304_v23 }
  0x7b   :  { %v1545_v46 = vshrl.u32 %v486_v38, 30  ;;  %v543_v47 = vsub.s32 32, %v542_v63  ;;  %1184 = vcosq.f32 %v307_v21  ;;  %v1547_v53 = vshll.u32 %v536_v35, 8 }
  0x7c   :  { %v396_v51 = vshrl.u32 %v378_v7, %v394_v39  ;;  %v399_v1 = vadd.s32 127, %v398_v20  ;;  %v1549_v52 = vpop.eup %1182  ;;  %1186 = vsinq.f32 %v307_v21  ;;  %v545_v54 = vshll.u32 %v1253_v24, %v542_v63 }
  0x7d   :  { %v488_v43 = vshll.u32 %v1545_v46, 30  ;;  %v728_v13 = vadd.s32 3, %v308_v17  ;;  %vm317_vm11 = vcmp.eq.s32.totalorder %v1533_v36, 2  ;;  %v546_v2 = vshrl.u32 %v1254_v28, %v543_v47 }
  0x7e   :  { %v397_v29 = vor.u32 %v396_v51, %v395_v40  ;;  %v400_v55 = vshll.u32 %v399_v1, 23  ;;  %v548_v57 = vshll.u32 %v1254_v28, %v542_v63  ;;  %vm314_vm12 = vcmp.eq.s32.totalorder %v1533_v36, 0 }
  0x7f   :  { %v1557_v58 = vsub.s32 %v485_v33, %v488_v43  ;;  %v549_v59 = vshrl.u32 %v1255_v30, %v543_v47  ;;  %v551_v19 = vshll.u32 %v1255_v30, %v542_v63  ;;  %v552_v61 = vshrl.u32 %v1256_v32, %v543_v47 }
  0x80   :  { %vm313_vm13 = vcmp.lt.s32.totalorder %v1533_v36, 2  ;;  %v401_v62 = vor.u32 4788187, %v400_v55  ;;  %v404_v3 = vcvt.s32.f32 %v397_v29  ;;  %v481_v5 = vadd.s32 %v1483_v50, %v1499_v56 }
  0x81   :  { %v541_v6 = vshrl.u32 %v540_v26, 5  ;;  %vm311_vm14 = vweird.f32 %v1296_v44  ;;  %v491_v28 = vsub.s32 0, %v1557_v58  ;;  %v544_v16 = vshrl.u32 %v1253_v24, %v543_v47 }
  0x82   :  { %v1568_v60 = vand.u32 3, %v728_v13  ;;  %v1570_v9 = vadd.s32 3, %v411_v37  ;;  %v402_v30 = vand.u32 2147483647, %v401_v62  ;;  %v554_v25 = vshll.u32 %v1256_v32, %v542_v63 }
  0x83   :  { %v555_v18 = vshrl.u32 %v1257_v34, %v543_v47  ;;  %v557_v17 = vshll.u32 %v1257_v34, %v542_v63  ;;  %v1121_v50 = vmin.u32 %v491_v28, %v1557_v58  ;;  %v547_v56 = vor.u32 %v546_v2, %v545_v54 }
  0x84   :  { %v550_v7 = vor.u32 %v549_v59, %v548_v57  ;;  %v553_v33 = vor.u32 %v552_v61, %v551_v19  ;;  %v405_v26 = vmul.f32 %v404_v3, %v402_v30  ;;  %v558_v24 = vshrl.u32 %v1258_v41, %v543_v47 }
  0x85   :  { %v556_v31 = vor.u32 %v555_v18, %v554_v25  ;;  %vm560_vm15 = vcmp.lt.s32.totalorder %v541_v6, 1  ;;  %vm196_vm0 = vcmp.eq.f32.partialorder %v1401_v12, inf  ;;  %v493_v35 = vclz %v1121_v50  ;;  %v1185_v32 = vpop.eup %1184 }
  0x86   :  { %vm561_vm1 = vcmp.lt.s32.totalorder %v541_v6, 2  ;;  %vm563_vm2 = vcmp.lt.s32.totalorder %v541_v6, 4  ;;  %vm731_vm3 = vcmp.eq.s32.totalorder %v1568_v60, 0  ;;  %v406_v8 = vxor.u32 2147483648, %v405_v26  ;;  %v1187_v37 = vpop.eup %1186 }
  0x87   :  { %v559_v34 = vor.u32 %v558_v24, %v557_v17  ;;  %vm562_vm4 = vcmp.lt.s32.totalorder %v541_v6, 3  ;;  %v565_v63 = vsel %vm563_vm2, %v553_v33, 2102212464  ;;  %v318_v38 = vxor.u32 2147483648, %v1185_v32 }
  0x88   :  { %v1122_v23 = vadd.s32 4294967294, %v493_v35  ;;  %v564_v39 = vsel %vm560_vm15, %v544_v16, %v547_v56  ;;  %v568_v41 = vsel %vm560_vm15, %v547_v56, %v550_v7  ;;  %vm730_vm6 = vcmp.lt.s32.totalorder %v1568_v60, 2 }
  0x89   :  { %v315_v40 = vxor.u32 2147483648, %v1187_v37  ;;  %v407_v20 = vsel %vm324_vm5, %v406_v8, %v405_v26  ;;  %v566_v21 = vsel %vm562_vm4, %v550_v7, %v565_v63  ;;  %v569_v47 = vsel %vm563_vm2, %v556_v31, 920167782  ;;  %v1055_v8 = vld [vmem:[#allocation3] sm:$0xff] }
  0x8a   :  { %v319_v51 = vsel %vm317_vm11, %v318_v38, %v1187_v37  ;;  %v410_v1 = vsel %vm1489_vm7, %v1298_v48, %v407_v20  ;;  %vm1123_vm8 = vcmp.lt.s32.totalorder %v1122_v23, 0  ;;  %v570_v43 = vsel %vm562_vm4, %v553_v33, %v569_v47 }
  0x8b   :  { %v316_v54 = vsel %vm314_vm12, %v1185_v32, %v315_v40  ;;  %1188 = vcosq.f32 %v410_v1  ;;  %v496_v13 = vsel %vm1123_vm8, 0, %v1122_v23  ;;  %v571_v29 = vsel %vm561_vm1, %v568_v41, %v570_v43 }
  0x8c   :  { %v320_v55 = vsel %vm313_vm13, %v316_v54, %v319_v51  ;;  %1190 = vsinq.f32 %v410_v1  ;;  %v497_v2 = vsub.s32 32, %v496_v13  ;;  %v498_v57 = vshll.u32 %v1557_v58, %v496_v13  ;;  %v1059_v51 = vld [vmem:[#allocation3 + $0x20] sm:$0xff] }
  0x8d   :  { %vm198_vm5 = vcmp.eq.f32.partialorder %v1401_v12, 0.0  ;;  %v321_v42 = vsel %vm311_vm14, nan, %v320_v55  ;;  %v501_v59 = vsub.s32 4294967266, %v496_v13  ;;  %v572_v19 = vsel %vm560_vm15, %v550_v7, %v553_v33 }
  0x8e   :  { %v573_v61 = vsel %vm563_vm2, %v559_v34, 1326507024  ;;  %v499_v62 = vshrl.u32 %v481_v5, %v497_v2  ;;  %v1606_v36 = vmul.u32.u64.low %v1547_v53, %v571_v29  ;;  %v1607_v28 = vmul.u32.u64.high %v1547_v53, %v571_v29, %v1606_v36 }
  0x8f   :  { %v574_v3 = vsel %vm562_vm4, %v556_v31, %v573_v61  ;;  %v502_v16 = vadd.s32 127, %v501_v59  ;;  %v567_v58 = vsel %vm561_vm1, %v564_v39, %v566_v21  ;;  %v631_v25 = vmul.f32 %v321_v42, %v1519_v15 }
  0x90   :  { %v575_v30 = vsel %vm561_vm1, %v572_v19, %v574_v3  ;;  %vm414_vm7 = vweird.f32 %v1298_v48  ;;  %vm427_vm9 = vcmp.lt.s32.totalorder %v1304_v4, 0  ;;  %v500_v18 = vor.u32 %v499_v62, %v498_v57  ;;  %v1056_v3 = vld [vmem:[#allocation3 + $0x8] sm:$0xff] }
  0x91   :  { %v1616_v5 = vmul.u32.u64.low %v1547_v53, %v575_v30  ;;  %v1617_v17 = vmul.u32.u64.high %v1547_v53, %v575_v30, %v1616_v5  ;;  %v733_v50 = vsel %vm731_vm3, %v1185_v32, %v315_v40  ;;  %v197_v6 = vsel %vm196_vm0, %v1401_v12, %v1522_v22 }
  0x92   :  { %vm1627_vm10 = vcmp.le.f32.partialorder %v425_v14, 0.7853982  ;;  %v503_v7 = vshll.u32 %v502_v16, 23  ;;  %vm734_vm11 = vcmp.eq.s32.totalorder %v1568_v60, 2  ;;  %v833_v33 = vand.u32 3, %v1570_v9  ;;  %v1060_v16 = vld [vmem:[#allocation3 + $0x28] sm:$0xff] }
  0x93   :  { %v583_v26 = vmul.u32 %v1547_v53, %v567_v58  ;;  %v586_v31 = vadd.s32 1, %v1607_v28  ;;  %v736_v24 = vsel %vm734_vm11, %v318_v38, %v1187_v37  ;;  %v1063_v35 = vmul.f32 0.1, %v631_v25 }
  0x94   :  { %vm417_vm12 = vcmp.eq.s32.totalorder %v1543_v45, 0  ;;  %v504_v22 = vor.u32 4788187, %v503_v7  ;;  %v507_v32 = vcvt.s32.f32 %v500_v18  ;;  %v737_v14 = vsel %vm730_vm6, %v733_v50, %v736_v24 }
  0x95   :  { %vm420_vm13 = vcmp.eq.s32.totalorder %v1543_v45, 2  ;;  %v511_v34 = vsub.s32 4, %v1545_v46  ;;  %vm585_vm15 = vc.u32 %v1617_v17, %v1606_v36  ;;  %v738_v53 = vsel %vm311_vm14, nan, %v737_v14  ;;  %v1189_v9 = vpop.eup %1188 }
  0x96   :  { %v505_v63 = vand.u32 2147483647, %v504_v22  ;;  %v587_v37 = vsel %vm585_vm15, %v586_v31, %v1607_v28  ;;  %vm838_vm0 = vcmp.eq.s32.totalorder %v833_v33, 2  ;;  %v1051_v38 = vmul.f32 %v738_v53, %v1519_v15  ;;  %v1191_v60 = vpop.eup %1190 }
  0x97   :  { %v421_v23 = vxor.u32 2147483648, %v1189_v9  ;;  %v588_v39 = vadd.s32 %v587_v37, %v583_v26  ;;  %vm835_vm1 = vcmp.eq.s32.totalorder %v833_v33, 0  ;;  %v1067_v41 = vadd.f32 %v1063_v35, %v1055_v8 }
  0x98   :  { %vm416_vm2 = vcmp.lt.s32.totalorder %v1543_v45, 2  ;;  %v418_v40 = vxor.u32 2147483648, %v1191_v60  ;;  %v508_v20 = vmul.f32 %v507_v32, %v505_v63  ;;  %vm834_vm3 = vcmp.lt.s32.totalorder %v833_v33, 2 }
  0x99   :  { %v200_v44 = vsel %vm198_vm5, %v199_v11, %v197_v6  ;;  %v422_v21 = vsel %vm420_vm13, %v421_v23, %v1191_v60  ;;  %v589_v47 = vadd.s32 536870912, %v588_v39  ;;  %v840_v15 = vsel %vm838_vm0, %v421_v23, %v1191_v60  ;;  %1071 = vst [vmem:[#allocation6] sm:$0xff] %v1067_v41 }
  0x9a   :  { %v419_v1 = vsel %vm417_vm12, %v1189_v9, %v418_v40  ;;  %v509_v43 = vxor.u32 2147483648, %v508_v20  ;;  %v837_v54 = vsel %vm835_vm1, %v1189_v9, %v418_v40  ;;  %v1075_v13 = vmul.f32 0.1, %v1051_v38 }
  0x9b   :  { %v423_v29 = vsel %vm416_vm2, %v419_v1, %v422_v21  ;;  %v512_v55 = vsel %vm427_vm9, %v511_v34, %v1545_v46  ;;  %v1658_v12 = vshrl.u32 %v589_v47, 30  ;;  %v841_v11 = vsel %vm834_vm3, %v837_v54, %v840_v15  ;;  %v1061_v1 = vld [vmem:[#allocation3 + $0x30] sm:$0xff] }
  0x9c   :  { %v424_v2 = vsel %vm414_vm7, nan, %v423_v29  ;;  %v510_v57 = vsel %vm427_vm9, %v509_v43, %v508_v20  ;;  %v842_v45 = vsel %vm414_vm7, nan, %v841_v11  ;;  %v1079_v42 = vadd.f32 %v1075_v13, %v1059_v51  ;;  %v1057_v51 = vld [vmem:[#allocation3 + $0x10] sm:$0xff] }
  0x9d   :  { %v513_v59 = vsel %vm1627_vm10, %v1304_v4, %v510_v57  ;;  %v591_v19 = vshll.u32 %v1658_v12, 30  ;;  %v632_v46 = vmul.f32 %v424_v2, %v200_v44  ;;  %v514_v61 = vsel %vm1627_vm10, 0, %v512_v55 }
  0x9e   :  { %1192 = vcosq.f32 %v513_v59  ;;  %v1052_v62 = vmul.f32 %v842_v45, %v200_v44  ;;  %1083 = vst [vmem:[#allocation6 + $0x20] sm:$0xff] %v1079_v42  ;;  %v936_v25 = vadd.s32 3, %v514_v61  ;;  %v202_v6 = vmul.f32 %v1549_v52, %v1415_v27 }
  0x9f   :  { %1194 = vsinq.f32 %v513_v59  ;;  %v592_v28 = vsub.s32 %v588_v39, %v591_v19  ;;  %v1064_v48 = vmul.f32 0.1, %v632_v46  ;;  %v518_v56 = vand.u32 3, %v514_v61 }
  0xa0   :  { %v1076_v58 = vmul.f32 0.1, %v1052_v62  ;;  %vm203_vm14 = vcmp.eq.f32.partialorder %v1415_v27, inf  ;;  %v937_v33 = vand.u32 3, %v936_v25  ;;  %vm517_vm4 = vweird.f32 %v1304_v4 }
  0xa1   :  { %v594_v30 = vsub.s32 0, %v592_v28  ;;  %v1068_v18 = vadd.f32 %v1064_v48, %v1056_v3  ;;  %v182_v26 = vmul.f32 0.6931472, %v1375_v49  ;;  %vm205_vm6 = vcmp.eq.f32.partialorder %v1415_v27, 0.0 }
  0xa2   :  { %v1080_v5 = vadd.f32 %v1076_v58, %v1060_v16  ;;  %v206_v31 = vand.u32 2147483648, %v1415_v27  ;;  %v204_v22 = vsel %vm203_vm14, %v1415_v27, %v202_v6  ;;  %vm520_vm8 = vcmp.eq.s32.totalorder %v518_v56, 0 }
  0xa3   :  { %v1125_v50 = vmin.u32 %v594_v30, %v592_v28  ;;  %1072 = vst [vmem:[#allocation6 + $0x8] sm:$0xff] %v1068_v18  ;;  %vm523_vm5 = vcmp.eq.s32.totalorder %v518_v56, 2  ;;  %v584_v52 = vadd.s32 %v1606_v36, %v1617_v17  ;;  %vm939_vm9 = vcmp.eq.s32.totalorder %v937_v33, 0 }
  0xa4   :  { %1084 = vst [vmem:[#allocation6 + $0x28] sm:$0xff] %v1080_v5  ;;  %vm942_vm10 = vcmp.eq.s32.totalorder %v937_v33, 2  ;;  %vm519_vm11 = vcmp.lt.s32.totalorder %v518_v56, 2  ;;  %vm938_vm12 = vcmp.lt.s32.totalorder %v937_v33, 2  ;;  %v207_v37 = vsel %vm205_vm6, %v206_v31, %v204_v22  ;;  %v1058_v22 = vld [vmem:[#allocation3 + $0x18] sm:$0xff] }
  0xa5   :  { %v596_v7 = vclz %v1125_v50  ;;  %v186_v27 = vmul.f32 -2.0, %v182_v26  ;;  %v614_v11 = vsub.s32 4, %v1658_v12  ;;  %vm530_vm13 = vcmp.lt.s32.totalorder %v1336_v0, 0 }
  0xa6   :  { %vm529_vm15 = vcmp.le.f32.partialorder %v528_v10, 0.7853982 }
  0xa7   :  { %v1126_v24 = vadd.s32 4294967294, %v596_v7  ;;  %1196 = vrsqrt.f32 %v186_v27  ;;  %v615_v42 = vsel %vm530_vm13, %v614_v11, %v1658_v12  ;;  %vm210_vm0 = vcmp.eq.f32.partialorder %v186_v27, inf }
  0xa8   :  { %v1193_v35 = vpop.eup %1192  ;;  %v617_v46 = vsel %vm529_vm15, 0, %v615_v42  ;;  %vm212_vm1 = vcmp.eq.f32.partialorder %v186_v27, 0.0  ;;  %v213_v58 = vand.u32 2147483648, %v186_v27 }
  0xa9   :  { %v1195_v32 = vpop.eup %1194  ;;  %v524_v14 = vxor.u32 2147483648, %v1193_v35  ;;  %vm1127_vm7 = vcmp.lt.s32.totalorder %v1126_v24, 0  ;;  %v1040_v61 = vadd.s32 3, %v617_v46  ;;  %v621_v3 = vand.u32 3, %v617_v46 }
  0xaa   :  { %v521_v49 = vxor.u32 2147483648, %v1195_v32  ;;  %v599_v8 = vsel %vm1127_vm7, 0, %v1126_v24 }
  0xab   :  { %v525_v34 = vsel %vm523_vm5, %v524_v14, %v1195_v32  ;;  %v600_v53 = vsub.s32 32, %v599_v8  ;;  %v601_v9 = vshll.u32 %v592_v28, %v599_v8  ;;  %v604_v63 = vsub.s32 4294967266, %v599_v8 }
  0xac   :  { %v522_v38 = vsel %vm520_vm8, %v1193_v35, %v521_v49  ;;  %v941_v60 = vsel %vm939_vm9, %v1193_v35, %v521_v49  ;;  %v944_v36 = vsel %vm942_vm10, %v524_v14, %v1195_v32  ;;  %v1041_v28 = vand.u32 3, %v1040_v61 }
  0xad   :  { %v526_v17 = vsel %vm519_vm11, %v522_v38, %v525_v34  ;;  %v602_v23 = vshrl.u32 %v584_v52, %v600_v53  ;;  %v605_v39 = vadd.s32 127, %v604_v63  ;;  %v945_v41 = vsel %vm938_vm12, %v941_v60, %v944_v36  ;;  %v1062_v52 = vld [vmem:[#allocation3 + $0x38] sm:$0xff] }
  0xae   :  { %v527_v40 = vsel %vm517_vm4, nan, %v526_v17  ;;  %v946_v20 = vsel %vm517_vm4, nan, %v945_v41  ;;  %vm626_vm2 = vcmp.eq.s32.totalorder %v621_v3, 2  ;;  %vm1046_vm3 = vcmp.eq.s32.totalorder %v1041_v28, 2 }
  0xaf   :  { %v603_v44 = vor.u32 %v602_v23, %v601_v9  ;;  %v606_v21 = vshll.u32 %v605_v39, 23  ;;  %v633_v47 = vmul.f32 %v527_v40, %v207_v37  ;;  %v1053_v15 = vmul.f32 %v946_v20, %v207_v37 }
  0xb0   :  { %vm623_vm14 = vcmp.eq.s32.totalorder %v621_v3, 0  ;;  %vm1043_vm4 = vcmp.eq.s32.totalorder %v1041_v28, 0  ;;  %vm622_vm6 = vcmp.lt.s32.totalorder %v621_v3, 2  ;;  %vm1042_vm8 = vcmp.lt.s32.totalorder %v1041_v28, 2 }
  0xb1   :  { %v607_v43 = vor.u32 4788187, %v606_v21  ;;  %v610_v54 = vcvt.s32.f32 %v603_v44  ;;  %v1065_v13 = vmul.f32 0.1, %v633_v47  ;;  %v1077_v29 = vmul.f32 0.1, %v1053_v15  ;;  %v1197_v62 = vpop.eup %1196 }
  0xb2   :  { %v209_v16 = vmul.f32 %v1197_v62, %v186_v27  ;;  %vm620_vm5 = vweird.f32 %v1336_v0 }
  0xb3   :  { %v608_v55 = vand.u32 2147483647, %v607_v43  ;;  %v1069_v2 = vadd.f32 %v1065_v13, %v1057_v51  ;;  %v1081_v57 = vadd.f32 %v1077_v29, %v1061_v1 }
  0xb4   :  { %v211_v30 = vsel %vm210_vm0, %v186_v27, %v209_v16 }
  0xb5   :  { %v611_v45 = vmul.f32 %v610_v54, %v608_v55  ;;  %1073 = vst [vmem:[#allocation6 + $0x10] sm:$0xff] %v1069_v2  ;;  %1085 = vst [vmem:[#allocation6 + $0x30] sm:$0xff] %v1081_v57  ;;  %v214_v50 = vsel %vm212_vm1, %v213_v58, %v211_v30 }
  0xb7   :  { %v612_v4 = vxor.u32 2147483648, %v611_v45 }
  0xb9   :  { %v613_v59 = vsel %vm530_vm13, %v612_v4, %v611_v45 }
  0xba   :  { %v616_v19 = vsel %vm529_vm15, %v1336_v0, %v613_v59 }
  0xbb   :  { %1198 = vcosq.f32 %v616_v19 }
  0xbc   :  { %1200 = vsinq.f32 %v616_v19 }
  0xc5   :  { %v1199_v48 = vpop.eup %1198 }
  0xc6   :  { %v1201_v10 = vpop.eup %1200  ;;  %v627_v12 = vxor.u32 2147483648, %v1199_v48 }
  0xc7   :  { %v624_v25 = vxor.u32 2147483648, %v1201_v10 }
  0xc8   :  { %v628_v18 = vsel %vm626_vm2, %v627_v12, %v1201_v10  ;;  %v1048_v5 = vsel %vm1046_vm3, %v627_v12, %v1201_v10 }
  0xc9   :  { %v625_v6 = vsel %vm623_vm14, %v1199_v48, %v624_v25  ;;  %v1045_v56 = vsel %vm1043_vm4, %v1199_v48, %v624_v25 }
  0xca   :  { %v629_v7 = vsel %vm622_vm6, %v625_v6, %v628_v18  ;;  %v1049_v33 = vsel %vm1042_vm8, %v1045_v56, %v1048_v5 }
  0xcb   :  { %v630_v26 = vsel %vm620_vm5, nan, %v629_v7  ;;  %v1050_v31 = vsel %vm620_vm5, nan, %v1049_v33 }
  0xcc   :  { %v634_v24 = vmul.f32 %v630_v26, %v214_v50  ;;  %v1054_v35 = vmul.f32 %v1050_v31, %v214_v50 }
  0xce   :  { %v1066_v32 = vmul.f32 0.1, %v634_v24  ;;  %v1078_v14 = vmul.f32 0.1, %v1054_v35 }
  0xd0   :  { %v1070_v49 = vadd.f32 %v1066_v32, %v1058_v22  ;;  %v1082_v8 = vadd.f32 %v1078_v14, %v1062_v52 }
  0xd2   :  { %1074 = vst [vmem:[#allocation6 + $0x18] sm:$0xff] %v1070_v49  ;;  %1086 = vst [vmem:[#allocation6 + $0x38] sm:$0xff] %v1082_v8 }
  0xd3   :  { %1235 = shalt.err (!%p1232_p12)
}
  0xd4   :  { %s1236_s10 = scalar_lea.hbm %s1713_s2, 1024 }
  0xd5   :  { %p1237_p13 = scmp.ne.s32.totalorder %s1713_s2, %s1236_s10  ;;  %p1240_p0 = scmp.lt.u32.totalorder %s1236_s10, %s1713_s2 }
  0xd7   :  { %p1242_p1 = pnand %p1240_p0, %p1237_p13 }
  0xd9   :  { %1245 = shalt.err (!%p1242_p1)
}
  0xda   :  { %1098 = dma.vmem_to_hbm [thread:$0]  %s1093_s6, 1024, %s1713_s2, [#allocation5], %s1251_s19, %s1251_s19, %s1252_s20  }
  0xdb   :  { %1248 = dma.done.wait [#allocation5], 1024  }
  0xdc   :  { %1249 = vsyncadd [#allocation5], 4294966272 }
  0xdd   :  { %1102 = vsyncpa [#allocation4], 1 }
  0xde   :  { %1103 = vsyncpa [#allocation5], 1 }

</bundles_post_ra>
